<compile_context>
chip_gen: v6e
topology: v6e:2x2x1
jax: 0.10.0
libtpu: 0.0.40
codegen_flags: <defaults>
</compile_context>

<pallas_src>
import jax
import jax.numpy as jnp
from jax.experimental import pallas as pl
from jax.experimental.pallas import tpu as pltpu


def _anomaly_map_kernel(x_ref, ct_ref, rneg_ref, o_ref):
    """One batch block per grid step.

    x_ref    : (bt, C, H, W)   hidden variables (native dtype)
    ct_ref   : (W, Wo)         transposed column-interpolation matrix (f32)
    rneg_ref : (Ho, H)         NEGATED row-interpolation matrix (f32)
    o_ref    : (bt, Ho, Wo)    output anomaly-map block (f32)
    """
    bt, c, h, w = x_ref.shape

    # --- sum of squares over channels ---------------------------------------
    # Chunked over C so the live f32 upcast of the (possibly bf16) block stays
    # bounded; the accumulator is a single (bt, H, W) f32 tensor.
    c_chunk = min(c, 16)
    sumsq = jnp.zeros((bt, h, w), jnp.float32)
    for c0 in range(0, c, c_chunk):
        c1 = min(c, c0 + c_chunk)
        xc = x_ref[:, c0:c1, :, :].astype(jnp.float32)       # (bt, cc, H, W)
        sumsq = sumsq + jnp.sum(xc * xc, axis=1)             # (bt, H, W)

    # prob = exp(-0.5 * mean(x^2, channels)); constants folded into one scale.
    prob = jnp.exp(sumsq * (-0.5 / c))                       # (bt, H, W)

    # --- separable bilinear resize (align_corners=True) on the MXU ----------
    # The leading minus of `-prob` is folded into rneg.  Per-batch-element 2-D
    # matmuls (no block-diagonal matrix): resize cost is linear in bt.
    ct = ct_ref[...]                                         # (W, Wo)
    rneg = rneg_ref[...]                                     # (Ho, H)
    for b in range(bt):                                      # static unroll
        tmp = jnp.dot(prob[b], ct, preferred_element_type=jnp.float32)    # (H, Wo)
        out_b = jnp.dot(rneg, tmp, preferred_element_type=jnp.float32)    # (Ho, Wo)
        o_ref[b, :, :] = out_b.astype(o_ref.dtype)


def _interp_matrix(out_size: int, in_size: int, dtype=jnp.float32):
    """Bilinear interpolation matrix M (out_size, in_size), align_corners=True.

    out[i] = sum_j M[i, j] * in[j]
    """
    idx = jnp.arange(out_size, dtype=jnp.float32)
    scale = (in_size - 1) / (out_size - 1) if out_size > 1 else 0.0
    src = idx * scale
    i0 = jnp.clip(jnp.floor(src).astype(jnp.int32), 0, in_size - 1)
    i1 = jnp.clip(i0 + 1, 0, in_size - 1)
    w1 = src - i0.astype(jnp.float32)
    w0 = 1.0 - w1
    oh0 = jax.nn.one_hot(i0, in_size, dtype=dtype)
    oh1 = jax.nn.one_hot(i1, in_size, dtype=dtype)
    return w0[:, None] * oh0 + w1[:, None] * oh1


def _vmem_capacity_bytes() -> int:
    """Physical VMEM of the current chip; conservative 64 MiB if unknown."""
    try:
        cap = int(pltpu.get_tpu_info().vmem_capacity_bytes)
        if cap > 0:
            return cap
    except Exception:
        pass
    return 64 << 20


def anomaly_map(hidden_variables: jax.Array, input_size: tuple[int, int],
                batch_block: int | None = None) -> jax.Array:
    """JAX/Pallas equivalent of AnomalyMap.forward.

    hidden_variables: (B, C, H, W), any float dtype (kept native in HBM)
    returns:          (B, 1, Ho, Wo) f32 with (Ho, Wo) == input_size
    """
    B, C, H, W = hidden_variables.shape
    Ho, Wo = int(input_size[0]), int(input_size[1])
    itemsize = jnp.dtype(hidden_variables.dtype).itemsize

    # Interpolation matrices (wrapper-side JAX; tiny).  Minus sign of `-prob`
    # is folded into the row matrix.
    r_neg = -_interp_matrix(Ho, H)                           # (Ho, H)
    ct = _interp_matrix(Wo, W).T                             # (W, Wo)

    # ---- generation-aware VMEM budget ---------------------------------------
    cap = _vmem_capacity_bytes()             # 128 MiB (v5e/v6e) or 64 MiB (v7x)
    vmem_limit = int(min(cap, 112 << 20))    # leave headroom on 128 MiB parts

    c_chunk = min(C, 16)

    def _need_bytes(bt: int) -> int:
        in_blk = bt * C * H * W * itemsize               # double-buffered input
        out_blk = bt * Ho * Wo * 4                       # double-buffered output
        mats = (W * Wo + Ho * H) * 4                     # interp matrices (x2)
        temps = bt * (c_chunk * H * W + 2 * H * W + H * Wo + Ho * Wo) * 4
        return 2 * in_blk + 2 * out_blk + 2 * mats + temps + (4 << 20)

    if batch_block is None:
        bt = None
        for cand in range(B, 0, -1):
            if B % cand:
                continue
            # Keep >= 2 grid steps whenever B >= 2 so both v7x TensorCores get
            # work; negligible cost on single-TC v5e/v6e.
            if B >= 2 and B // cand < 2:
                continue
            if _need_bytes(cand) <= vmem_limit:
                bt = cand
                break
        if bt is None:
            bt = 1
    else:
        bt = int(batch_block)
        assert B % bt == 0, "batch_block must divide batch size"

    need = _need_bytes(bt)
    assert need <= vmem_limit, (
        f"anomaly_map: batch block bt={bt} needs ~{need >> 20} MiB VMEM, more "
        f"than the {vmem_limit >> 20} MiB limit on this chip. "
        f"(TODO(synk): add a C-reduction grid axis for this regime.)")

    grid = (B // bt,)
    cost = pl.CostEstimate(
        flops=int(2 * B * C * H * W + 2 * B * H * W * Wo + 2 * B * Ho * H * Wo),
        transcendentals=int(B * H * W),
        bytes_accessed=int(B * C * H * W * itemsize + B * Ho * Wo * 4
                           + (W * Wo + Ho * H) * 4),
    )

    out = pl.pallas_call(
        _anomaly_map_kernel,
        out_shape=jax.ShapeDtypeStruct((B, Ho, Wo), jnp.float32),
        grid_spec=pltpu.PrefetchScalarGridSpec(
            num_scalar_prefetch=0,
            grid=grid,
            in_specs=[
                pl.BlockSpec((bt, C, H, W), lambda bb: (bb, 0, 0, 0)),
                # Constant block index -> the pipeline fetches these once and
                # re-uses the resident copy on later grid steps.
                pl.BlockSpec((W, Wo), lambda bb: (0, 0)),
                pl.BlockSpec((Ho, H), lambda bb: (0, 0)),
            ],
            out_specs=pl.BlockSpec((bt, Ho, Wo), lambda bb: (bb, 0, 0)),
        ),
        compiler_params=pltpu.CompilerParams(
            dimension_semantics=("parallel",),
            vmem_limit_bytes=int(vmem_limit),
        ),
        cost_estimate=cost,
    )(hidden_variables, ct, r_neg)

    return out.reshape(B, 1, Ho, Wo)


def _reference(hidden_variables: jax.Array, input_size: tuple[int, int]) -> jax.Array:
    """Pure-JAX reference (same math, no Pallas) for validation."""
    Ho, Wo = int(input_size[0]), int(input_size[1])
    _, _, H, W = hidden_variables.shape
    log_prob = -jnp.mean(hidden_variables.astype(jnp.float32) ** 2,
                         axis=1, keepdims=True) * 0.5
    prob = jnp.exp(log_prob)
    r_mat = _interp_matrix(Ho, H)
    c_mat = _interp_matrix(Wo, W)
    return jnp.einsum("oh,bchw,qw->bcoq", r_mat, -prob, c_mat)


if __name__ == "__main__":
    # Module config: input_size = (32, 32); hidden variables at half resolution.
    input_size = (32, 32)
    B, C, H, W = 2, 4, 16, 16

    key = jax.random.PRNGKey(0)
    hidden = jax.random.normal(key, (B, C, H, W), dtype=jnp.float32)

    out = jax.block_until_ready(anomaly_map(hidden, input_size))
    ref = jax.block_until_ready(_reference(hidden, input_size))

    assert out.shape == (B, 1, input_size[0], input_size[1]), out.shape
    assert jnp.allclose(out, ref, atol=1e-5, rtol=1e-5), "mismatch vs reference"

    print("KERNEL_OK")
</pallas_src>

<mosaic_0001>
module attributes {stable_mosaic.version = 11 : i64} {
  func.func @_anomaly_map_kernel(%arg0: i32, %arg1: memref<1x4x16x16xf32, #tpu.memory_space<vmem>>, %arg2: memref<16x32xf32, #tpu.memory_space<vmem>>, %arg3: memref<32x16xf32, #tpu.memory_space<vmem>>, %arg4: memref<1x32x32xf32, #tpu.memory_space<vmem>>) attributes {dimension_semantics = [#tpu.dimension_semantics<parallel>], iteration_bounds = array<i64: 2>, scalar_prefetch = 0 : i64, scratch_operands = 0 : i64, tpu.core_type = #tpu.core_type<tc>, window_params = [{transform_indices = @transform_0, window_bounds = array<i64: 1, 4, 16, 16>}, {pipeline_mode = #tpu.pipeline_mode<synchronous>, transform_indices = @transform_1, window_bounds = array<i64: 16, 32>}, {pipeline_mode = #tpu.pipeline_mode<synchronous>, transform_indices = @transform_2, window_bounds = array<i64: 32, 16>}, {transform_indices = @transform_3, window_bounds = array<i64: 1, 32, 32>}]} {
    %cst = arith.constant 0.000000e+00 : f32
    %0 = vector.broadcast %cst : f32 to vector<1x16x16xf32>
    %c0 = arith.constant 0 : index
    %c0_0 = arith.constant 0 : index
    %c0_1 = arith.constant 0 : index
    %c0_2 = arith.constant 0 : index
    %1 = vector.load %arg1[%c0, %c0_0, %c0_1, %c0_2] : memref<1x4x16x16xf32, #tpu.memory_space<vmem>>, vector<1x4x16x16xf32>
    %2 = arith.mulf %1, %1 : vector<1x4x16x16xf32>
    %cst_3 = arith.constant dense<0.000000e+00> : vector<1x16x16xf32>
    %3 = vector.multi_reduction <add>, %2, %cst_3 [1] : vector<1x4x16x16xf32> to vector<1x16x16xf32>
    %4 = arith.addf %0, %3 : vector<1x16x16xf32>
    %cst_4 = arith.constant -1.250000e-01 : f32
    %5 = vector.broadcast %cst_4 : f32 to vector<1x16x16xf32>
    %6 = arith.mulf %4, %5 : vector<1x16x16xf32>
    %7 = math.exp %6 : vector<1x16x16xf32>
    %c0_5 = arith.constant 0 : index
    %c0_6 = arith.constant 0 : index
    %8 = vector.load %arg2[%c0_5, %c0_6] : memref<16x32xf32, #tpu.memory_space<vmem>>, vector<16x32xf32>
    %c0_7 = arith.constant 0 : index
    %c0_8 = arith.constant 0 : index
    %9 = vector.load %arg3[%c0_7, %c0_8] : memref<32x16xf32, #tpu.memory_space<vmem>>, vector<32x16xf32>
    %10 = vector.shape_cast %7 : vector<1x16x16xf32> to vector<16x16xf32>
    %cst_9 = arith.constant dense<0.000000e+00> : vector<16x32xf32>
    %11 = tpu.matmul %10, %8, %cst_9 {dimension_numbers = #tpu.dot_dimension_numbers<[1], [0], [0], [1], [0, 0, 1, 1], [], []>} : vector<16x16xf32>, vector<16x32xf32>, vector<16x32xf32> -> vector<16x32xf32>
    %cst_10 = arith.constant dense<0.000000e+00> : vector<32x32xf32>
    %12 = tpu.matmul %9, %11, %cst_10 {dimension_numbers = #tpu.dot_dimension_numbers<[1], [0], [0], [1], [0, 0, 1, 1], [], []>} : vector<32x16xf32>, vector<16x32xf32>, vector<32x32xf32> -> vector<32x32xf32>
    %c0_11 = arith.constant 0 : index
    %c0_12 = arith.constant 0 : index
    %c0_13 = arith.constant 0 : index
    %13 = vector.load %arg4[%c0_11, %c0_12, %c0_13] : memref<1x32x32xf32, #tpu.memory_space<vmem>>, vector<1x32x32xf32>
    %14 = vector.shape_cast %13 : vector<1x32x32xf32> to vector<32x32xf32>
    %15 = vector.shape_cast %12 : vector<32x32xf32> to vector<1x32x32xf32>
    tpu.vector_store %arg4[%c0_11, %c0_12, %c0_13], %15 {strides = array<i32>} : memref<1x32x32xf32, #tpu.memory_space<vmem>>, vector<1x32x32xf32>,
    return
  }
  func.func @transform_0(%arg0: i32) -> (i32, i32, i32, i32) {
    %c0_i32 = arith.constant 0 : i32
    %c0_i32_0 = arith.constant 0 : i32
    %c0_i32_1 = arith.constant 0 : i32
    %c0_i32_2 = arith.constant 0 : i32
    return %arg0, %c0_i32, %c0_i32_0, %c0_i32_1 : i32, i32, i32, i32
  }
  func.func @transform_1(%arg0: i32) -> (i32, i32) {
    %c0_i32 = arith.constant 0 : i32
    %c0_i32_0 = arith.constant 0 : i32
    %c0_i32_1 = arith.constant 0 : i32
    return %c0_i32, %c0_i32_0 : i32, i32
  }
  func.func @transform_2(%arg0: i32) -> (i32, i32) {
    %c0_i32 = arith.constant 0 : i32
    %c0_i32_0 = arith.constant 0 : i32
    %c0_i32_1 = arith.constant 0 : i32
    return %c0_i32, %c0_i32_0 : i32, i32
  }
  func.func @transform_3(%arg0: i32) -> (i32, i32, i32) {
    %c0_i32 = arith.constant 0 : i32
    %c0_i32_0 = arith.constant 0 : i32
    %c0_i32_1 = arith.constant 0 : i32
    return %arg0, %c0_i32, %c0_i32_0 : i32, i32, i32
  }
}

</mosaic_0001>

<bundles_post_ra>
// kernel: tpu_custom_call.1
= control target key start
LH: loop header
LB: loop body
LE: loop exit
PB: predicated region body
PF: predicated region fallthrough
CT: control target
= control target key end

     0   :  { %8 = vsyncpa [#allocation3], 0  ;;  %s914_s0 = inlined_call_operand.hbm [shape: f32[2,4,16,16], index: 0, kind: input, shape index: {}]   ;;  %s915_s1 = inlined_call_operand.vmem [shape: f32[16,32], index: 1, kind: input, shape index: {}]   ;;  %s916_s2 = inlined_call_operand.vmem [shape: f32[32,16], index: 2, kind: input, shape index: {}]   ;;  %s917_s3 = inlined_call_operand.hbm [shape: f32[2,32,32], index: 3, kind: output, shape index: {}]  }
   0x1   :  { %10 = vsyncpa [#allocation3 + $0x1], 0 }
   0x2   :  { %11 = vsyncpa [#allocation4], 0 }
   0x3   :  { %13 = vsyncpa [#allocation4 + $0x1], 0  ;;  %s727_s12 = smov 0   ;;  %s729_s13 = smov 0  }
   0x4   :  { %s731_s14 = smov 0   ;;  %s733_s15 = smov 0  }
   0x5 LB: > { %s748_s16 = sadd.s32 4294967295, %s699_s15   ;;  %s504_s17 = sadd.s32 4294967294, %s699_s15   ;;  %s699_s15 = sphi %s733_s15, %s932_s15   ;;  %s695_s14 = sphi %s731_s14, %s931_s14   ;;  %s691_s13 = sphi %s729_s13, %s930_s13   ;;  %s687_s12 = sphi %s727_s12, %s929_s12  }
   0x6   : > { %s752_s18 = sadd.s32 1, %s699_s15   ;;  %s26_s19 = sadd.s32 1, %s695_s14 }
   0x7   : > { %s23_s20 = ssub.s32 %s699_s15, %s752_s18  ;;  %p33_p0 = scmp.ne.s32.totalorder %s695_s14, %s691_s13 }
   0x8   : > { %p24_p1 = scmp.eq.s32.totalorder %s23_s20, 0  ;;  %p34_p2 = scmp.eq.s32.totalorder %s699_s15, 0 }
   0x9   : > { %p39_p3 = scmp.ne.s32.totalorder %s691_s13, %s687_s12  ;;  %p40_p4 = scmp.eq.s32.totalorder %s748_s16, 0 }
   0xa   : > { %s764_s21 = scalar_select %p24_p1, %s695_s14, %s26_s19  }
   0xb   : > { %p766_p5 = por %p34_p2, %p33_p0  ;;  %p770_p6 = por %p40_p4, %p39_p3 }
   0xc   : > { %p105_p7 = scmp.eq.s32.totalorder %s748_s16, 1  ;;  %p111_p8 = scmp.eq.s32.totalorder %s504_s17, 1 }
   0xd   : > { %s921_s23 = scalar_select %p770_p6, 1, 0 }
   0xe   : > { %p565_p10 = scmp.lt.s32.totalorder %s699_s15, 2  ;;  %p777_p11 = por %p105_p7, %p33_p0 }
   0xf   : > { %p781_p12 = por %p111_p8, %p39_p3  ;;  %s137_s26 = sand.u32 1, %s695_s14  }
  0x10   : > { %s922_s24 = scalar_select %p777_p11, 1, 0 }
  0x11   : > { %s923_s25 = scalar_select %p781_p12, 1, 0 }
  0x12   : > { %s524_s27 = sshll.u32 %s699_s15, 10  ;;  %s507_s28 = sshll.u32 %s137_s26, 6 }
  0x13   : > { %s790_s4 = scalar_lea.hbm %s914_s0, %s524_s27  ;;  %s141_s5 = scalar_lea.vmem [#allocation2], %s507_s28 }
  0x14   : > { %s148_s6 = sshll.u32 %s141_s5, 4  ;;  %p794_p13 = pnand %p565_p10, %p766_p5  ;;  %s798_s6 = int_to_ptr.vmem [resolvable:$true] %s148_s6 }
  0x15   : > { %s800_s8 = scalar_lea.sflag [#allocation3], %s137_s26  ;;  %s607_s9 = scalar_lea.hbm %s790_s4, 1024 }
  0x16   : > { %p608_p0 = scmp.ne.s32.totalorder %s790_s4, %s607_s9  ;;  %p609_p1 = pneg %p794_p13 }
  0x17   : > { %s612_s17 = scalar_lea.hbm %s914_s0, 2048  ;;  %p613_p4 = scmp.lt.s32.totalorder %s790_s4, %s914_s0 }
  0x18   : > { %p610_p2 = pnand %p609_p1, %p608_p0  ;;  %p614_p5 = scmp.lt.s32.totalorder %s612_s17, %s607_s9 }
  0x1a   : > { %p611_p3 = pneg %p610_p2  ;;  %p615_p7 = por %p614_p5, %p613_p4 }
  0x1c   : > { %p616_p8 = pnand %p615_p7, %p611_p3 }
  0x1e   : > { %619 = shalt.err (!%p616_p8)
}
  0x1f   : > { %s620_s22 = scalar_lea.vmem %s798_s6, 1024  ;;  %s701_s26 = smov [#allocation2]  }
  0x20   : > { %p621_p10 = scmp.ne.s32.totalorder %s798_s6, %s620_s22  ;;  %s625_s27 = sshll.u32 %s701_s26, 4  ;;  %s626_s27 = int_to_ptr.vmem [resolvable:$false] %s625_s27 }
  0x21   : > { %s627_s28 = scalar_lea.vmem %s626_s27, 2048  ;;  %p628_p2 = scmp.lt.s32.totalorder %s798_s6, %s626_s27 }
  0x22   : > { %p623_p9 = pnand %p621_p10, %p609_p1  ;;  %p629_p12 = scmp.lt.s32.totalorder %s627_s28, %s620_s22 }
  0x24   : > { %p624_p0 = pneg %p623_p9  ;;  %p630_p11 = por %p629_p12, %p628_p2 }
  0x26   : > { %p631_p6 = pnand %p630_p11, %p624_p0 }
  0x28   : > { %634 = shalt.err (!%p631_p6)
}
  0x29   : > { %s702_s29 = smov 128   ;;  %s703_s30 = smov 8  }
  0x2a   : > { %560 = dma.hbm_to_vmem [thread:$0]  (!%p794_p13), %s790_s4, 1024, %s798_s6, %s800_s8, %s702_s29, %s702_s29, %s703_s30  }
  0x2b   : > { %p510_p9 = scmp.ge.s32.totalorder %s699_s15, 1  ;;  %p156_p1 = scmp.lt.s32.totalorder %s699_s15, 3 }
  0x2d   : > { %p157_p3 = pnand %p510_p9, %p156_p1 }
  0x2e   : > { %s824_s5 = sand.u32 (!%p157_p3), 1, %s691_s13   ;;  %p925_p6 = scmp.ne.s32.totalorder (!%p157_p3), %s921_s23, 0 }
  0x2f   : > { %160 = sbr.rel (%p157_p3) target bundleno = 493 (0x1ed), region = 32  ;;  %s511_s9 = sshll.u32 (!%p157_p3), %s824_s5, 6 }
  0x30   : > { %s163_s10 = scalar_lea.sflag (!%p157_p3), [#allocation3], %s824_s5  ;;  %s166_s11 = scalar_lea.vmem (!%p157_p3), [#allocation2], %s511_s9 }
  0x34   : > { %678 = dma.done.wait (%p925_p6), %s163_s10, 1024  }
  0x35   : > { %680 = vsyncadd (%p925_p6), %s163_s10, 4294966272  ;;  %v229_v0 = vld [vmem:[%s915_s1 + $0x8] sm:$0xff]  ;;  %v228_v1 = vld [vmem:[%s915_s1] sm:$0xff]  ;;  %vm205_vm0 = vcmask 130048   ;;  %s512_s29 = sshll.u32 %s824_s5, 5  ;;  %vm412_vm1 = vcmask 261120  }
  0x36   : > { %v189_v2 = vld [vmem:[%s166_s11] sm:$0xff]  ;;  %536 = vmatprep.subr.mxu0 %v229_v0  ;;  %v191_v3 = vld [vmem:[%s166_s11 + $0x10] sm:$0xff]  ;;  %v190_v10 = vld [vmem:[%s166_s11 + $0x8] sm:$0xff]  ;;  %s188_s30 = scalar_lea.vmem [#allocation5], %s512_s29  ;;  %s525_s10 = sshll.u32 %s748_s16, 9 }
  0x37   : > { %v193_v4 = vld [vmem:[%s166_s11 + $0x20] sm:$0xff]  ;;  %v195_v5 = vld [vmem:[%s166_s11 + $0x30] sm:$0xff]  ;;  %v197_v6 = vmul.f32 %v189_v2, %v189_v2  ;;  %537 = vmatpush3.msra.mxu0 %v229_v0  ;;  %v199_v7 = vmul.f32 %v191_v3, %v191_v3  ;;  %v192_v11 = vld [vmem:[%s166_s11 + $0x18] sm:$0xff]  ;;  %v198_v15 = vmul.f32 %v190_v10, %v190_v10  ;;  %s431_s9 = sshll.u32 %s188_s30, 4  ;;  %s871_s4 = scalar_lea.hbm %s917_s3, %s525_s10  ;;  %s866_s9 = int_to_ptr.vmem [resolvable:$true] %s431_s9 }
  0x38   : > { %v201_v8 = vmul.f32 %v193_v4, %v193_v4  ;;  %v203_v9 = vmul.f32 %v195_v5, %v195_v5  ;;  %v194_v12 = vld [vmem:[%s166_s11 + $0x28] sm:$0xff]  ;;  %538 = vmatprep.subr.mxu0 %v228_v1  ;;  %v196_v14 = vld [vmem:[%s166_s11 + $0x38] sm:$0xff]  ;;  %v200_v16 = vmul.f32 %v192_v11, %v192_v11  ;;  %v230_v38 = vld [vmem:[%s916_s2] sm:$0xff]  ;;  %s418_s6 = scalar_lea.sflag [#allocation4], %s824_s5  ;;  %s635_s8 = scalar_lea.vmem %s866_s9, 512 }
  0x39   : > { %v206_v13 = vsel %vm205_vm0, %v197_v6, 0.0  ;;  %v202_v17 = vmul.f32 %v194_v12, %v194_v12  ;;  %539 = vmatpush3.msra.mxu0 %v228_v1  ;;  %v207_v18 = vsel %vm205_vm0, %v199_v7, 0.0  ;;  %v204_v20 = vmul.f32 %v196_v14, %v196_v14  ;;  %547 = vmatprep.mubr.msk.f32.mxu1 %vm205_vm0, %v230_v38  ;;  %v231_v41 = vld [vmem:[%s916_s2 + $0x8] sm:$0xff]  ;;  %v232_v42 = vld [vmem:[%s916_s2 + $0x10] sm:$0xff]  ;;  %v233_v43 = vld [vmem:[%s916_s2 + $0x18] sm:$0xff]  ;;  %p636_p11 = scmp.ne.s32.totalorder %s866_s9, %s635_s8  ;;  %p926_p12 = scmp.ne.s32.totalorder %s922_s24, 0 }
  0x3a   : > { %v209_v19 = vsel %vm205_vm0, %v201_v8, 0.0  ;;  %v208_v21 = vadd.f32 %v207_v18, %v206_v13  ;;  %v213_v22 = vsel %vm205_vm0, %v198_v15, 0.0  ;;  %v214_v23 = vsel %vm205_vm0, %v200_v16, 0.0  ;;  %s704_s16 = smov [#allocation5]  }
  0x3b   : > { %v216_v24 = vsel %vm205_vm0, %v202_v17, 0.0  ;;  %v211_v25 = vsel %vm205_vm0, %v203_v9, 0.0  ;;  %v215_v26 = vadd.f32 %v214_v23, %v213_v22  ;;  %v218_v28 = vsel %vm205_vm0, %v204_v20, 0.0  ;;  %p637_p13 = pnand %p636_p11, %p926_p12  ;;  %s639_s23 = sshll.u32 %s704_s16, 4  ;;  %s640_s23 = int_to_ptr.vmem [resolvable:$false] %s639_s23 }
  0x3c   : > { %v210_v27 = vadd.f32 %v209_v19, %v208_v21  ;;  %s641_s17 = scalar_lea.vmem %s640_s23, 1024  ;;  %p642_p5 = scmp.lt.s32.totalorder %s866_s9, %s640_s23 }
  0x3d   : > { %v217_v29 = vadd.f32 %v216_v24, %v215_v26  ;;  %p638_p4 = pneg %p637_p13  ;;  %p643_p7 = scmp.lt.s32.totalorder %s641_s17, %s635_s8 }
  0x3e   : > { %v212_v30 = vadd.f32 %v211_v25, %v210_v27 }
  0x3f   : > { %v219_v31 = vadd.f32 %v218_v28, %v217_v29  ;;  %p644_p8 = por %p643_p7, %p642_p5 }
  0x40   : > { %v222_v32 = vmul.f32 -0.125, %v212_v30 }
  0x41   : > { %v223_v33 = vmul.f32 -0.125, %v219_v31  ;;  %p645_p10 = pnand %p644_p8, %p638_p4 }
  0x42   : > { %v224_v34 = vmul.f32 1.442695, %v222_v32 }
  0x43   : > { %v226_v35 = vmul.f32 1.442695, %v223_v33 }
  0x44   : > { %603 = vpow2.f32 %v224_v34 }
  0x45   : > { %605 = vpow2.f32 %v226_v35 }
  0x51   : > { %v604_v36 = vpop.eup %603 }
  0x52   : > { %v606_v37 = vpop.eup %605  ;;  %540 = vmatprep.mubr.msk.f32.mxu0 %vm205_vm0, %v604_v36 }
  0x53   : > { %541 = vmatmul.mubr.msk.f32.vlgmr.msra.gmra.mxu0 %vm205_vm0, %v606_v37 }
 0x113   : > { %v542_v39 = vpop.f32.mrf.mxu0 }
 0x114   : > { %543 = vmatprep.subr.mxu1 %v542_v39 }
 0x115   : > { %v306_v40 = vpop.f32.mrf.mxu0  ;;  %544 = vmatpush3.msra.mxu1 %v542_v39 }
 0x116   : > { %545 = vmatprep.subr.mxu1 %v306_v40 }
 0x117   : > { %546 = vmatpush3.msra.mxu1 %v306_v40 }
 0x118   : > { %548 = vmatmul.mubr.msk.f32.vlgmr.msra.gmra.mxu1 %vm205_vm0, %v231_v41 }
 0x119   : > { %550 = vmatprep.mubr.msk.f32.mxu1 %vm205_vm0, %v232_v42 }
 0x11c   : > { %551 = vmatmul.mubr.msk.f32.gmra.mxu1 %vm205_vm0, %v233_v43 }
 0x1d8   : > { %v549_v44 = vpop.f32.mrf.mxu1 }
 0x1d9   : > { %414 = vst.msk [vmem:[%s188_s30 + $0x8] sm:$0xff] %vm412_vm1, %v549_v44 }
 0x1da   : > { %v393_v45 = vpop.f32.mrf.mxu1 }
 0x1db   : > { %413 = vst.msk [vmem:[%s188_s30] sm:$0xff] %vm412_vm1, %v393_v45 }
 0x1dc   : > { %v552_v46 = vpop.f32.mrf.mxu1 }
 0x1dd   : > { %416 = vst.msk [vmem:[%s188_s30 + $0x18] sm:$0xff] %vm412_vm1, %v552_v46 }
 0x1de   : > { %v403_v47 = vpop.f32.mrf.mxu1 }
 0x1df   : > { %415 = vst.msk [vmem:[%s188_s30 + $0x10] sm:$0xff] %vm412_vm1, %v403_v47 }
 0x1e0   : > { %648 = shalt.err (!%p645_p10)
}
 0x1e1   : > { %s649_s19 = scalar_lea.hbm %s871_s4, 512  ;;  %s653_s26 = scalar_lea.hbm %s917_s3, 1024 }
 0x1e2   : > { %p650_p0 = scmp.ne.s32.totalorder %s871_s4, %s649_s19  ;;  %p654_p1 = scmp.lt.s32.totalorder %s871_s4, %s917_s3 }
 0x1e3   : > { %p655_p3 = scmp.lt.s32.totalorder %s653_s26, %s649_s19 }
 0x1e4   : > { %p651_p2 = pnand %p650_p0, %p926_p12 }
 0x1e5   : > { %p656_p6 = por %p655_p3, %p654_p1 }
 0x1e6   : > { %p652_p9 = pneg %p651_p2 }
 0x1e8   : > { %p657_p11 = pnand %p656_p6, %p652_p9 }
 0x1ea   : > { %660 = shalt.err (!%p657_p11)
}
 0x1eb   : > { %s705_s29 = smov 128   ;;  %s706_s30 = smov 8  }
 0x1ec   : > { %555 = dma.vmem_to_hbm [thread:$0]  (%p926_p12), %s866_s9, 512, %s871_s4, %s418_s6, %s705_s29, %s705_s29, %s706_s30  }
 0x1ed PF: > { %s446_s10 = sand.u32 1, %s687_s12   ;;  %p927_p13 = scmp.ne.s32.totalorder %s923_s25, 0 }
 0x1ee   : > { %p928_p4 = scmp.ge.s32.totalorder %s699_s15, 2  ;;  %s447_s11 = scalar_lea.sflag [#allocation4], %s446_s10 }
 0x1f0   : > { %p562_p5 = pnand %p928_p4, %p927_p13 }
 0x1f2   : > { %p563_p7 = pneg %p562_p5 }
 0x1f4   : > { %682 = dma.done.wait (%p563_p7), %s447_s11, 512  }
 0x1f5   : > { %684 = vsyncadd (%p563_p7), %s447_s11, 4294966784  ;;  %p16_p8 = scmp.ge.s32.totalorder %s752_s18, 4   ;;  %s929_s12 = smov %s691_s13 }
 0x1f6   : > { %s930_s13 = smov %s695_s14  ;;  %s931_s14 = smov %s764_s21 }
 0x1f7   : > { %s932_s15 = smov %s752_s18  ;;  %18 = sbr.rel (!%p16_p8) target bundleno = 5 (0x5), region = 77 }
 0x1fc   :  { %452 = vsyncpa [#allocation3], 1 }
 0x1fd   :  { %454 = vsyncpa [#allocation3 + $0x1], 1 }
 0x1fe   :  { %455 = vsyncpa [#allocation4], 1 }
 0x1ff   :  { %457 = vsyncpa [#allocation4 + $0x1], 1 }

</bundles_post_ra>
